<compile_context>
chip_gen: v6e
topology: v6e:2x2x1
jax: 0.10.0
libtpu: 0.0.40
codegen_flags: <defaults>
</compile_context>

<pallas_src>
import math
import functools

import jax
import jax.numpy as jnp
from jax.experimental import pallas as pl
from jax.experimental.pallas import tpu as pltpu


def _round_up(x: int, m: int) -> int:
    return ((x + m - 1) // m) * m


def _choose_row_tile(n: int, tm_max: int = 512):
    """Row (M) tile: multiple of 8; >=2 tiles when possible (megacore)."""
    if n <= 8:
        return 8, 8
    n_tiles = max(2, -(-n // tm_max))
    tm = _round_up(-(-n // n_tiles), 8)
    return tm, tm * n_tiles


def _choose_k_tile(n: int, tk_max: int = 1024):
    """Reduction (K) tile: multiple of 128, <= tk_max, minimal padding."""
    kp = _round_up(n, 128)
    tk = 128
    for mult in range(min(tk_max // 128, kp // 128), 0, -1):
        if kp % (128 * mult) == 0:
            tk = 128 * mult
            break
    return tk, kp


def _vmem_limit(est_bytes: int) -> int:
    # Double-buffering + compiler scratch headroom; stay under v7x's 64 MiB.
    return int(min(60 * 1024 * 1024, max(16 * 1024 * 1024, 2 * est_bytes)))


# ---------------------------------------------------------------------------
# Kernels
# ---------------------------------------------------------------------------

def _gcn_fused_adjx_kernel(adj_ref, x_ref, w_ref, b_ref, o_ref, acc_ref):
    """out = (adj @ x) @ W + b   (used when padded F_in <= padded F_out).

    adj/x are bf16 MXU inputs with an f32 accumulator; the second (small)
    matmul runs entirely in f32, so the partial sum is never re-quantized.
    """
    k = pl.program_id(1)

    @pl.when(k == 0)
    def _():
        acc_ref[...] = jnp.zeros_like(acc_ref)

    acc_ref[...] += jnp.dot(adj_ref[...], x_ref[...],
                            preferred_element_type=jnp.float32)

    @pl.when(k == pl.num_programs(1) - 1)
    def _():
        o_ref[...] = (
            jnp.dot(acc_ref[...], w_ref[...],
                    preferred_element_type=jnp.float32)
            + b_ref[...]
        ).astype(o_ref.dtype)


def _support_kernel(x_ref, w_ref, s_ref):
    """support = x @ W   (bf16 in, f32 accumulation, bf16 out)."""
    s_ref[...] = jnp.dot(
        x_ref[...], w_ref[...], preferred_element_type=jnp.float32
    ).astype(s_ref.dtype)


def _adj_support_kernel(adj_ref, s_ref, b_ref, o_ref):
    """out = adj @ support + b.

    Accumulates directly into the f32 output block (its block index is
    constant over the reduction axis, so it stays VMEM-resident) -- no
    scratch accumulator and no epilogue copy.
    """
    k = pl.program_id(1)

    @pl.when(k == 0)
    def _():
        o_ref[...] = jnp.zeros_like(o_ref)

    o_ref[...] += jnp.dot(adj_ref[...], s_ref[...],
                          preferred_element_type=jnp.float32)

    @pl.when(k == pl.num_programs(1) - 1)
    def _():
        o_ref[...] += b_ref[...]


# ---------------------------------------------------------------------------
# Wrapper
# ---------------------------------------------------------------------------

def gcn_forward(x, adj, weight, bias=None, *, tm_max=512, tk_max=1024,
                compute_dtype=jnp.bfloat16):
    """GCN layer:  adj @ (x @ weight) + bias  (f32 result)."""
    N, F_in = x.shape
    assert adj.shape == (N, N), f"adj must be [{N},{N}], got {adj.shape}"
    F_in_w, F_out = weight.shape
    assert F_in_w == F_in

    # Lane-dense feature dims: unmasked stores + full MXU contraction depth.
    F_in_p = _round_up(F_in, 128)
    F_out_p = _round_up(F_out, 128)

    tm, Mp = _choose_row_tile(N, tm_max)
    tk, Kp = _choose_k_tile(N, tk_max)
    grid = (Mp // tm, Kp // tk)
    itemsize = jnp.dtype(compute_dtype).itemsize

    # --- bf16 cast fused with (or instead of) the zero-pad pass ------------
    if Mp == N and Kp == N:
        adj_c = adj.astype(compute_dtype)
    else:
        adj_c = jnp.zeros((Mp, Kp), compute_dtype).at[:N, :N].set(
            adj.astype(compute_dtype))
    if Kp == N and F_in_p == F_in:
        x_c = x.astype(compute_dtype)
    else:
        x_c = jnp.zeros((Kp, F_in_p), compute_dtype).at[:N, :F_in].set(
            x.astype(compute_dtype))

    weight_f32 = jnp.asarray(weight, jnp.float32)
    if bias is None:
        b2d = jnp.zeros((1, F_out_p), jnp.float32)
    else:
        b2d = jnp.zeros((1, F_out_p), jnp.float32).at[0, :F_out].set(
            jnp.asarray(bias, jnp.float32))

    # Fused path keeps the full f32 weight resident in VMEM -> only use it
    # when that is cheap.  Otherwise precompute support once and stream it.
    use_fused = (F_in_p <= F_out_p) and (F_in_p * F_out_p * 4 <= 16 * 1024 * 1024)
    # TODO(synk): for very large feature dims (W block > ~16 MiB) add an
    # F_out grid axis instead of keeping the whole weight resident (v7x 64 MiB).

    if use_fused:
        # ------------------ out = (adj @ x) @ W + b -------------------------
        w_p = jnp.zeros((F_in_p, F_out_p), jnp.float32).at[:F_in, :F_out].set(
            weight_f32)
        flops = 2 * Mp * Kp * F_in_p + 2 * Mp * F_in_p * F_out_p
        bytes_accessed = (adj_c.size * itemsize
                          + grid[0] * Kp * F_in_p * itemsize   # x re-streamed
                          + w_p.size * 4 + b2d.size * 4
                          + Mp * F_out_p * 4)
        vmem_est = (2 * (tm * tk + tk * F_in_p) * itemsize
                    + (F_in_p * F_out_p + F_out_p) * 4
                    + 2 * tm * F_out_p * 4
                    + tm * F_in_p * 4)

        out = pl.pallas_call(
            _gcn_fused_adjx_kernel,
            out_shape=jax.ShapeDtypeStruct((Mp, F_out_p), jnp.float32),
            grid_spec=pltpu.PrefetchScalarGridSpec(
                num_scalar_prefetch=0,
                grid=grid,
                in_specs=[
                    pl.BlockSpec((tm, tk), lambda i, k: (i, k)),        # adj
                    pl.BlockSpec((tk, F_in_p), lambda i, k: (k, 0)),    # x
                    pl.BlockSpec((F_in_p, F_out_p), lambda i, k: (0, 0)),  # W
                    pl.BlockSpec((1, F_out_p), lambda i, k: (0, 0)),    # bias
                ],
                out_specs=pl.BlockSpec((tm, F_out_p), lambda i, k: (i, 0)),
                scratch_shapes=[pltpu.VMEM((tm, F_in_p), jnp.float32)],
            ),
            compiler_params=pltpu.CompilerParams(
                dimension_semantics=("parallel", "arbitrary"),
                vmem_limit_bytes=_vmem_limit(vmem_est),
            ),
            cost_estimate=pl.CostEstimate(
                flops=flops, transcendentals=0, bytes_accessed=bytes_accessed),
        )(adj_c, x_c, w_p, b2d)
    else:
        # --------------- support = x @ W  (computed exactly once) -----------
        w_p = jnp.zeros((F_in_p, F_out_p), compute_dtype).at[:F_in, :F_out].set(
            weight_f32.astype(compute_dtype))
        tsm = 128
        for mult in (4, 2, 1):
            cand = 128 * mult
            if Kp % cand == 0 and Kp // cand >= 2:
                tsm = cand
                break
        sup_vmem = (2 * (tsm * F_in_p + tsm * F_out_p) * itemsize
                    + F_in_p * F_out_p * itemsize)
        support = pl.pallas_call(
            _support_kernel,
            out_shape=jax.ShapeDtypeStruct((Kp, F_out_p), compute_dtype),
            grid_spec=pltpu.PrefetchScalarGridSpec(
                num_scalar_prefetch=0,
                grid=(Kp // tsm,),
                in_specs=[
                    pl.BlockSpec((tsm, F_in_p), lambda i: (i, 0)),
                    pl.BlockSpec((F_in_p, F_out_p), lambda i: (0, 0)),
                ],
                out_specs=pl.BlockSpec((tsm, F_out_p), lambda i: (i, 0)),
            ),
            compiler_params=pltpu.CompilerParams(
                dimension_semantics=("parallel",),
                vmem_limit_bytes=_vmem_limit(sup_vmem),
            ),
            cost_estimate=pl.CostEstimate(
                flops=2 * Kp * F_in_p * F_out_p, transcendentals=0,
                bytes_accessed=(Kp * F_in_p + F_in_p * F_out_p
                                + Kp * F_out_p) * itemsize),
        )(x_c, w_p)

        # ------------------ out = adj @ support + b -------------------------
        flops = 2 * Mp * Kp * F_out_p
        bytes_accessed = (adj_c.size * itemsize
                          + grid[0] * Kp * F_out_p * itemsize  # support re-streamed
                          + b2d.size * 4 + Mp * F_out_p * 4)
        vmem_est = (2 * (tm * tk + tk * F_out_p) * itemsize
                    + F_out_p * 4 + 2 * tm * F_out_p * 4)
        out = pl.pallas_call(
            _adj_support_kernel,
            out_shape=jax.ShapeDtypeStruct((Mp, F_out_p), jnp.float32),
            grid_spec=pltpu.PrefetchScalarGridSpec(
                num_scalar_prefetch=0,
                grid=grid,
                in_specs=[
                    pl.BlockSpec((tm, tk), lambda i, k: (i, k)),        # adj
                    pl.BlockSpec((tk, F_out_p), lambda i, k: (k, 0)),   # support
                    pl.BlockSpec((1, F_out_p), lambda i, k: (0, 0)),    # bias
                ],
                out_specs=pl.BlockSpec((tm, F_out_p), lambda i, k: (i, 0)),
            ),
            compiler_params=pltpu.CompilerParams(
                dimension_semantics=("parallel", "arbitrary"),
                vmem_limit_bytes=_vmem_limit(vmem_est),
            ),
            cost_estimate=pl.CostEstimate(
                flops=flops, transcendentals=0, bytes_accessed=bytes_accessed),
        )(adj_c, support, b2d)

    return out[:N, :F_out]


class GraphConvolution:
    """JAX/Pallas port of the PyTorch GraphConvolution module."""

    def __init__(self, in_features, out_features, bias=True, *, key):
        self.in_features = in_features
        self.out_features = out_features
        stdv = 1.0 / math.sqrt(out_features)
        k_w, k_b = jax.random.split(key)
        # uniform(-stdv, stdv) init, same as reset_parameters().
        self.weight = jax.random.uniform(
            k_w, (in_features, out_features), jnp.float32, -stdv, stdv)
        if bias:
            self.bias = jax.random.uniform(
                k_b, (out_features,), jnp.float32, -stdv, stdv)
        else:
            self.bias = None
        # jit so the wrapper-side cast/pad passes fuse into single HBM sweeps.
        self._fwd = jax.jit(gcn_forward)

    def __call__(self, inputs, adj):
        return self._fwd(inputs, adj, self.weight, self.bias)


if __name__ == "__main__":
    key = jax.random.PRNGKey(0)
    k_x, k_x2, k_adj, k_p1, k_p2 = jax.random.split(key, 5)

    N = 128  # number of graph nodes

    adj_raw = jax.random.uniform(k_adj, (N, N), jnp.float32)
    adj = adj_raw / jnp.sum(adj_raw, axis=1, keepdims=True)  # row-normalized

    # --- Path A: F_in <= F_out  (fully fused (adj@x)@W kernel) -------------
    x1 = jax.random.normal(k_x, (N, 64), jnp.float32)
    layer1 = GraphConvolution(64, 128, bias=True, key=k_p1)
    out1 = jax.block_until_ready(layer1(x1, adj))
    ref1 = adj @ (x1 @ layer1.weight) + layer1.bias[None, :]
    assert out1.shape == (N, 128)
    assert jnp.allclose(out1, ref1, atol=2e-2, rtol=2e-2), (
        float(jnp.max(jnp.abs(out1 - ref1))))

    # --- Path B: F_in > F_out  (support precomputed once, then streamed) ---
    x2 = jax.random.normal(k_x2, (N, 256), jnp.float32)
    layer2 = GraphConvolution(256, 64, bias=True, key=k_p2)
    out2 = jax.block_until_ready(layer2(x2, adj))
    ref2 = adj @ (x2 @ layer2.weight) + layer2.bias[None, :]
    assert out2.shape == (N, 64)
    assert jnp.allclose(out2, ref2, atol=2e-2, rtol=2e-2), (
        float(jnp.max(jnp.abs(out2 - ref2))))

    print("KERNEL_OK")
</pallas_src>

<mosaic_0001>
module attributes {stable_mosaic.version = 11 : i64} {
  func.func @_gcn_fused_adjx_kernel(%arg0: i32, %arg1: i32, %arg2: memref<64x128xbf16, #tpu.memory_space<vmem>>, %arg3: memref<128x128xbf16, #tpu.memory_space<vmem>>, %arg4: memref<128x128xf32, #tpu.memory_space<vmem>>, %arg5: memref<1x128xf32, #tpu.memory_space<vmem>>, %arg6: memref<64x128xf32, #tpu.memory_space<vmem>>, %arg7: memref<64x128xf32, #tpu.memory_space<vmem>>) attributes {dimension_semantics = [#tpu.dimension_semantics<parallel>, #tpu.dimension_semantics<arbitrary>], iteration_bounds = array<i64: 2, 1>, scalar_prefetch = 0 : i64, scratch_operands = 1 : i64, tpu.core_type = #tpu.core_type<tc>, window_params = [{transform_indices = @transform_0, window_bounds = array<i64: 64, 128>}, {transform_indices = @transform_1, window_bounds = array<i64: 128, 128>}, {pipeline_mode = #tpu.pipeline_mode<synchronous>, transform_indices = @transform_2, window_bounds = array<i64: 128, 128>}, {pipeline_mode = #tpu.pipeline_mode<synchronous>, transform_indices = @transform_3, window_bounds = array<i64: 1, 128>}, {transform_indices = @transform_4, window_bounds = array<i64: 64, 128>}]} {
    %c0_i32 = arith.constant 0 : i32
    %0 = arith.cmpi eq, %arg1, %c0_i32 : i32
    %1 = arith.extui %0 : i1 to i32
    %c0_i32_0 = arith.constant 0 : i32
    %2 = arith.cmpi ne, %1, %c0_i32_0 : i32
    scf.if %2 {
      %cst_10 = arith.constant 0.000000e+00 : f32
      %12 = vector.broadcast %cst_10 : f32 to vector<64x128xf32>
      %c0_11 = arith.constant 0 : index
      %c0_12 = arith.constant 0 : index
      %13 = vector.load %arg7[%c0_11, %c0_12] : memref<64x128xf32, #tpu.memory_space<vmem>>, vector<64x128xf32>
      tpu.vector_store %arg7[%c0_11, %c0_12], %12 {strides = array<i32>} : memref<64x128xf32, #tpu.memory_space<vmem>>, vector<64x128xf32>,
    } else {
    }
    %c0 = arith.constant 0 : index
    %c0_1 = arith.constant 0 : index
    %3 = vector.load %arg7[%c0, %c0_1] : memref<64x128xf32, #tpu.memory_space<vmem>>, vector<64x128xf32>
    %c0_2 = arith.constant 0 : index
    %c0_3 = arith.constant 0 : index
    %4 = vector.load %arg2[%c0_2, %c0_3] : memref<64x128xbf16, #tpu.memory_space<vmem>>, vector<64x128xbf16>
    %c0_4 = arith.constant 0 : index
    %c0_5 = arith.constant 0 : index
    %5 = vector.load %arg3[%c0_4, %c0_5] : memref<128x128xbf16, #tpu.memory_space<vmem>>, vector<128x128xbf16>
    %cst = arith.constant dense<0.000000e+00> : vector<64x128xf32>
    %6 = tpu.matmul %4, %5, %cst {dimension_numbers = #tpu.dot_dimension_numbers<[1], [0], [0], [1], [0, 0, 1, 1], [], []>} : vector<64x128xbf16>, vector<128x128xbf16>, vector<64x128xf32> -> vector<64x128xf32>
    %7 = arith.addf %3, %6 : vector<64x128xf32>
    %c0_6 = arith.constant 0 : index
    %c0_7 = arith.constant 0 : index
    %8 = vector.load %arg7[%c0_6, %c0_7] : memref<64x128xf32, #tpu.memory_space<vmem>>, vector<64x128xf32>
    tpu.vector_store %arg7[%c0_6, %c0_7], %7 {strides = array<i32>} : memref<64x128xf32, #tpu.memory_space<vmem>>, vector<64x128xf32>,
    %c0_i32_8 = arith.constant 0 : i32
    %9 = arith.cmpi eq, %arg1, %c0_i32_8 : i32
    %10 = arith.extui %9 : i1 to i32
    %c0_i32_9 = arith.constant 0 : i32
    %11 = arith.cmpi ne, %10, %c0_i32_9 : i32
    scf.if %11 {
      %c0_10 = arith.constant 0 : index
      %c0_11 = arith.constant 0 : index
      %12 = vector.load %arg7[%c0_10, %c0_11] : memref<64x128xf32, #tpu.memory_space<vmem>>, vector<64x128xf32>
      %c0_12 = arith.constant 0 : index
      %c0_13 = arith.constant 0 : index
      %13 = vector.load %arg4[%c0_12, %c0_13] : memref<128x128xf32, #tpu.memory_space<vmem>>, vector<128x128xf32>
      %cst_14 = arith.constant dense<0.000000e+00> : vector<64x128xf32>
      %14 = tpu.matmul %12, %13, %cst_14 {dimension_numbers = #tpu.dot_dimension_numbers<[1], [0], [0], [1], [0, 0, 1, 1], [], []>} : vector<64x128xf32>, vector<128x128xf32>, vector<64x128xf32> -> vector<64x128xf32>
      %c0_15 = arith.constant 0 : index
      %c0_16 = arith.constant 0 : index
      %15 = vector.load %arg5[%c0_15, %c0_16] : memref<1x128xf32, #tpu.memory_space<vmem>>, vector<1x128xf32>
      %16 = vector.broadcast %15 : vector<1x128xf32> to vector<64x128xf32>
      %17 = arith.addf %14, %16 : vector<64x128xf32>
      %c0_17 = arith.constant 0 : index
      %c0_18 = arith.constant 0 : index
      %18 = vector.load %arg6[%c0_17, %c0_18] : memref<64x128xf32, #tpu.memory_space<vmem>>, vector<64x128xf32>
      tpu.vector_store %arg6[%c0_17, %c0_18], %17 {strides = array<i32>} : memref<64x128xf32, #tpu.memory_space<vmem>>, vector<64x128xf32>,
    } else {
    }
    return
  }
  func.func @transform_0(%arg0: i32, %arg1: i32) -> (i32, i32) {
    %c0_i32 = arith.constant 0 : i32
    return %arg0, %arg1 : i32, i32
  }
  func.func @transform_1(%arg0: i32, %arg1: i32) -> (i32, i32) {
    %c0_i32 = arith.constant 0 : i32
    %c0_i32_0 = arith.constant 0 : i32
    return %arg1, %c0_i32 : i32, i32
  }
  func.func @transform_2(%arg0: i32, %arg1: i32) -> (i32, i32) {
    %c0_i32 = arith.constant 0 : i32
    %c0_i32_0 = arith.constant 0 : i32
    %c0_i32_1 = arith.constant 0 : i32
    return %c0_i32, %c0_i32_0 : i32, i32
  }
  func.func @transform_3(%arg0: i32, %arg1: i32) -> (i32, i32) {
    %c0_i32 = arith.constant 0 : i32
    %c0_i32_0 = arith.constant 0 : i32
    %c0_i32_1 = arith.constant 0 : i32
    return %c0_i32, %c0_i32_0 : i32, i32
  }
  func.func @transform_4(%arg0: i32, %arg1: i32) -> (i32, i32) {
    %c0_i32 = arith.constant 0 : i32
    %c0_i32_0 = arith.constant 0 : i32
    return %arg0, %c0_i32 : i32, i32
  }
}

</mosaic_0001>

<bundles_post_ra>
// kernel: gcn_forward.1
= control target key start
LH: loop header
LB: loop body
LE: loop exit
PB: predicated region body
PF: predicated region fallthrough
CT: control target
= control target key end

     0   :  { %9 = vsyncpa [#allocation4], 0  ;;  %s1196_s0 = inlined_call_operand.vmem [shape: bf16[128,128], index: 0, kind: input, shape index: {}]   ;;  %s1197_s1 = inlined_call_operand.vmem [shape: bf16[128,128], index: 1, kind: input, shape index: {}]   ;;  %s1198_s2 = inlined_call_operand.vmem [shape: f32[128,128], index: 2, kind: input, shape index: {}]   ;;  %s1199_s3 = inlined_call_operand.vmem [shape: f32[1,128], index: 3, kind: input, shape index: {}]   ;;  %s1200_s4 = inlined_call_operand.hbm [shape: f32[128,128], index: 4, kind: output, shape index: {}]  }
   0x1   :  { %11 = vsyncpa [#allocation4 + $0x1], 0  ;;  %s998_s15 = smov 0   ;;  %s1000_s16 = smov 0  }
   0x2   :  { %s1002_s17 = smov 0   ;;  %s1004_s18 = smov 0  }
   0x3   :  { %s1006_s19 = smov 0   ;;  %s1008_s20 = smov 0  }
   0x4 LB: > { %s691_s21 = sadd.s32 4294967295, %s968_s20   ;;  %s692_s22 = sadd.s32 4294967294, %s968_s20   ;;  %s968_s20 = sphi %s1008_s20, %s17_s20   ;;  %s964_s19 = sphi %s1006_s19, %s1207_s19   ;;  %s960_s18 = sphi %s1004_s18, %s1206_s18   ;;  %s956_s17 = sphi %s1002_s17, %s1205_s17   ;;  %s952_s16 = sphi %s1000_s16, %s1204_s16   ;;  %s948_s15 = sphi %s998_s15, %s1203_s15  }
   0x5   : > { %s29_s23 = sadd.s32 1, %s964_s19  ;;  %s132_s24 = sadd.s32 1, %s956_s17 }
   0x6   : > { %p31_p0 = scmp.ge.s32.totalorder %s29_s23, 2  ;;  %p142_p1 = scmp.ne.s32.totalorder %s956_s17, %s952_s16 }
   0x7   : > { %p143_p2 = scmp.eq.s32.totalorder %s691_s21, 1  ;;  %p148_p3 = scmp.ne.s32.totalorder %s952_s16, %s948_s15 }
   0x8   : > { %s1209_s23 = smov (%p31_p0, %s29_s23), 0  ;;  %p149_p5 = scmp.eq.s32.totalorder %s692_s22, 1 }
   0x9   : > { %p1038_p4 = por %p143_p2, %p142_p1  ;;  %s129_s26 = ssub.s32 %s964_s19, %s1209_s23 }
   0xa   : > { %p696_p6 = scmp.ge.s32.totalorder %s968_s20, 1  ;;  %p130_p7 = scmp.eq.s32.totalorder %s129_s26, 0 }
   0xb   : > { %p1045_p8 = por %p149_p5, %p148_p3  ;;  %p194_p9 = scmp.lt.s32.totalorder %s968_s20, 3 }
   0xc   : > { %s1051_s28 = scalar_select %p130_p7, %s956_s17, %s132_s24  }
   0xd   : > { %p195_p10 = pnand %p696_p6, %p194_p9 }
   0xe   : > { %s698_s5 = sshll.u32 (!%p195_p10), %s960_s18, 3  ;;  %s718_s21 = sshll.u32 (!%p195_p10), %s960_s18, 10 }
   0xf   : > { %198 = sbr.rel (%p195_p10) target bundleno = 475 (0x1db), region = 36  ;;  %p229_p11 = scmp.lt.s32.totalorder (!%p195_p10), %s698_s5, 15 }
  0x10   : > { %s1145_s29 = scalar_lea.hbm (!%p195_p10), %s1200_s4, %s718_s21 }
  0x14   : > { %v880_v0 = vld [vmem:[%s1197_s1 + $0x38] sm:$0xff]   ;;  %v881_v1 = vld [vmem:[%s1197_s1 + $0x30] sm:$0xff]   ;;  %s1211_s5 = smov (!%p229_p11, %s698_s5), 15  ;;  %v882_v2 = vld [vmem:[%s1197_s1 + $0x28] sm:$0xff]  }
  0x15   : > { %755 = vmatprep.subr.bf16.mxu0 %v880_v0  ;;  %s699_s10 = sshll.u32 %s1211_s5, 2  ;;  %v883_v3 = vld [vmem:[%s1197_s1 + $0x20] sm:$0xff]   ;;  %v884_v5 = vld [vmem:[%s1197_s1 + $0x18] sm:$0xff]   ;;  %v467_v7 = vld [vmem:[%s1198_s2 + $0x70] sm:$0xff]  ;;  %s970_s5 = smov [#allocation3]  }
  0x16   : > { %756 = vmatpush3.bf16.msra.mxu0 %v880_v0  ;;  %s1066_s13 = scalar_lea.vmem %s1196_s0, %s699_s10  ;;  %v468_v6 = vld [vmem:[%s1198_s2 + $0x78] sm:$0xff]  ;;  %v466_v8 = vld [vmem:[%s1198_s2 + $0x68] sm:$0xff]  ;;  %v885_v9 = vld [vmem:[%s1197_s1 + $0x10] sm:$0xff]   ;;  %s896_s6 = sshll.u32 %s970_s5, 4  ;;  %s897_s6 = int_to_ptr.vmem [resolvable:$false] %s896_s6 }
  0x17   : > { %757 = vmatprep.subr.bf16.mxu0 %v881_v1  ;;  %v888_v4 = vld [vmem:[%s1066_s13] sm:$0xff]   ;;  %779 = vmatprep.subr.mxu1 %v468_v6  ;;  %v464_v11 = vld [vmem:[%s1198_s2 + $0x58] sm:$0xff]  ;;  %v886_v12 = vld [vmem:[%s1197_s1 + $0x8] sm:$0xff]   ;;  %s898_s7 = scalar_lea.vmem %s897_s6, 2048 }
  0x18   : > { %771 = vmatprep.mubr.bf16.mxu0 %v888_v4  ;;  %780 = vmatpush3.msra.mxu1 %v468_v6  ;;  %v465_v10 = vld [vmem:[%s1198_s2 + $0x60] sm:$0xff]  ;;  %v463_v13 = vld [vmem:[%s1198_s2 + $0x50] sm:$0xff]  ;;  %v462_v14 = vld [vmem:[%s1198_s2 + $0x48] sm:$0xff] }
  0x19   : > { %781 = vmatprep.subr.mxu1 %v467_v7  ;;  %v887_v15 = vld [vmem:[%s1197_s1] sm:$0xff]   ;;  %v460_v17 = vld [vmem:[%s1198_s2 + $0x38] sm:$0xff]  ;;  %v459_v18 = vld [vmem:[%s1198_s2 + $0x30] sm:$0xff] }
  0x1a   : > { %758 = vmatpush3.bf16.msra.mxu0 %v881_v1  ;;  %782 = vmatpush3.msra.mxu1 %v467_v7  ;;  %v461_v16 = vld [vmem:[%s1198_s2 + $0x40] sm:$0xff]  ;;  %v889_v19 = vld [vmem:[%s1066_s13 + $0x8] sm:$0xff]   ;;  %v890_v21 = vld [vmem:[%s1066_s13 + $0x10] sm:$0xff]  }
  0x1b   : > { %759 = vmatprep.subr.bf16.mxu0 %v882_v2  ;;  %783 = vmatprep.subr.mxu1 %v466_v8  ;;  %v458_v20 = vld [vmem:[%s1198_s2 + $0x28] sm:$0xff]  ;;  %v457_v22 = vld [vmem:[%s1198_s2 + $0x20] sm:$0xff]  ;;  %v456_v23 = vld [vmem:[%s1198_s2 + $0x18] sm:$0xff] }
  0x1c   : > { %784 = vmatpush3.msra.mxu1 %v466_v8  ;;  %v891_v24 = vld [vmem:[%s1066_s13 + $0x18] sm:$0xff]   ;;  %v455_v25 = vld [vmem:[%s1198_s2 + $0x10] sm:$0xff]  ;;  %v454_v26 = vld [vmem:[%s1198_s2 + $0x8] sm:$0xff]  ;;  %s225_s13 = sand.u32 1, %s952_s16  }
  0x1d   : > { %785 = vmatprep.subr.mxu1 %v465_v10  ;;  %v453_v27 = vld [vmem:[%s1198_s2] sm:$0xff]  ;;  %s697_s10 = sshll.u32 %s225_s13, 6  ;;  %s1151_s18 = scalar_lea.sflag [#allocation4], %s225_s13 }
  0x1e   : > { %760 = vmatpush3.bf16.msra.mxu0 %v882_v2  ;;  %786 = vmatpush3.msra.mxu1 %v465_v10  ;;  %v712_v36 = vld [vmem:[%s1199_s3] ss:$0 sm:$0xff]  ;;  %s227_s14 = scalar_lea.vmem [#allocation3], %s697_s10 }
  0x1f   : > { %761 = vmatprep.subr.bf16.mxu0 %v883_v3  ;;  %787 = vmatprep.subr.mxu1 %v464_v11  ;;  %s603_s22 = sshll.u32 %s227_s14, 4  ;;  %s1147_s22 = int_to_ptr.vmem [resolvable:$true] %s603_s22 }
  0x20   : > { %788 = vmatpush3.msra.mxu1 %v464_v11  ;;  %s892_s30 = scalar_lea.vmem %s1147_s22, 1024  ;;  %p899_p1 = scmp.lt.s32.totalorder %s1147_s22, %s897_s6 }
  0x21   : > { %789 = vmatprep.subr.mxu1 %v463_v13  ;;  %p893_p12 = scmp.ne.s32.totalorder %s1147_s22, %s892_s30  ;;  %p900_p2 = scmp.lt.s32.totalorder %s898_s7, %s892_s30 }
  0x22   : > { %762 = vmatpush3.bf16.msra.mxu0 %v883_v3  ;;  %790 = vmatpush3.msra.mxu1 %v463_v13 }
  0x23   : > { %763 = vmatprep.subr.bf16.mxu0 %v884_v5  ;;  %791 = vmatprep.subr.mxu1 %v462_v14  ;;  %p894_p13 = pnand %p893_p12, %p1038_p4  ;;  %p901_p3 = por %p900_p2, %p899_p1 }
  0x24   : > { %792 = vmatpush3.msra.mxu1 %v462_v14 }
  0x25   : > { %793 = vmatprep.subr.mxu1 %v461_v16  ;;  %p895_p0 = pneg %p894_p13 }
  0x26   : > { %764 = vmatpush3.bf16.msra.mxu0 %v884_v5  ;;  %794 = vmatpush3.msra.mxu1 %v461_v16 }
  0x27   : > { %765 = vmatprep.subr.bf16.mxu0 %v885_v9  ;;  %795 = vmatprep.subr.mxu1 %v460_v17  ;;  %p902_p5 = pnand %p901_p3, %p895_p0 }
  0x28   : > { %796 = vmatpush3.msra.mxu1 %v460_v17 }
  0x29   : > { %797 = vmatprep.subr.mxu1 %v459_v18 }
  0x2a   : > { %766 = vmatpush3.bf16.msra.mxu0 %v885_v9  ;;  %798 = vmatpush3.msra.mxu1 %v459_v18 }
  0x2b   : > { %767 = vmatprep.subr.bf16.mxu0 %v886_v12  ;;  %799 = vmatprep.subr.mxu1 %v458_v20 }
  0x2c   : > { %800 = vmatpush3.msra.mxu1 %v458_v20 }
  0x2d   : > { %801 = vmatprep.subr.mxu1 %v457_v22 }
  0x2e   : > { %768 = vmatpush3.bf16.msra.mxu0 %v886_v12  ;;  %802 = vmatpush3.msra.mxu1 %v457_v22 }
  0x2f   : > { %769 = vmatprep.subr.bf16.mxu0 %v887_v15  ;;  %803 = vmatprep.subr.mxu1 %v456_v23 }
  0x30   : > { %804 = vmatpush3.msra.mxu1 %v456_v23 }
  0x31   : > { %805 = vmatprep.subr.mxu1 %v455_v25 }
  0x32   : > { %770 = vmatpush3.bf16.msra.mxu0 %v887_v15  ;;  %806 = vmatpush3.msra.mxu1 %v455_v25 }
  0x33   : > { %807 = vmatprep.subr.mxu1 %v454_v26 }
  0x34   : > { %808 = vmatpush3.msra.mxu1 %v454_v26 }
  0x35   : > { %772 = vmatmul.mubr.bf16.vlgmr.msra.gmra.mxu0 %v889_v19  ;;  %809 = vmatprep.subr.mxu1 %v453_v27 }
  0x36   : > { %775 = vmatprep.mubr.bf16.mxu0 %v890_v21  ;;  %810 = vmatpush3.msra.mxu1 %v453_v27 }
  0x3d   : > { %776 = vmatmul.mubr.bf16.gmra.mxu0 %v891_v24 }
  0xf5   : > { %v773_v28 = vpop.f32.mrf.mxu0 }
  0xf7   : > { %v395_v29 = vpop.f32.mrf.mxu0 }
  0xf8   : > { %811 = vmatprep.mubr.f32.mxu1 %v395_v29 }
  0xf9   : > { %v774_v30 = vpop.f32.mrf.mxu0 }
  0xfb   : > { %v398_v31 = vpop.f32.mrf.mxu0 }
  0xfc   : > { %812 = vmatmul.mubr.f32.vlgmr.msra.gmra.mxu1 %v398_v31 }
  0xfd   : > { %v777_v32 = vpop.f32.mrf.mxu0  ;;  %814 = vmatprep.mubr.f32.mxu1 %v773_v28 }
  0xff   : > { %v411_v33 = vpop.f32.mrf.mxu0 }
 0x100   : > { %815 = vmatmul.mubr.f32.gmra.mxu1 %v774_v30 }
 0x101   : > { %v778_v34 = vpop.f32.mrf.mxu0  ;;  %817 = vmatprep.mubr.f32.mxu1 %v411_v33 }
 0x103   : > { %v414_v35 = vpop.f32.mrf.mxu0 }
 0x104   : > { %818 = vmatmul.mubr.f32.gmra.mxu1 %v414_v35 }
 0x105   : > { %820 = vmatprep.mubr.f32.mxu1 %v777_v32 }
 0x108   : > { %821 = vmatmul.mubr.f32.gmra.mxu1 %v778_v34 }
 0x1bc   : > { %v813_v37 = vpop.f32.mrf.mxu1 }
 0x1bd   : > { %v548_v38 = vadd.f32 %v813_v37, %v712_v36 }
 0x1be   : > { %v542_v39 = vpop.f32.mrf.mxu1 }
 0x1bf   : > { %582 = vst [vmem:[%s227_s14 + $0x8] sm:$0xff] %v548_v38  ;;  %v543_v40 = vadd.f32 %v712_v36, %v542_v39 }
 0x1c0   : > { %v816_v41 = vpop.f32.mrf.mxu1 }
 0x1c1   : > { %581 = vst [vmem:[%s227_s14] sm:$0xff] %v543_v40  ;;  %v558_v42 = vadd.f32 %v816_v41, %v712_v36 }
 0x1c2   : > { %v552_v43 = vpop.f32.mrf.mxu1 }
 0x1c3   : > { %584 = vst [vmem:[%s227_s14 + $0x18] sm:$0xff] %v558_v42  ;;  %v553_v44 = vadd.f32 %v712_v36, %v552_v43 }
 0x1c4   : > { %v819_v45 = vpop.f32.mrf.mxu1 }
 0x1c5   : > { %583 = vst [vmem:[%s227_s14 + $0x10] sm:$0xff] %v553_v44  ;;  %v568_v46 = vadd.f32 %v819_v45, %v712_v36 }
 0x1c6   : > { %v562_v47 = vpop.f32.mrf.mxu1 }
 0x1c7   : > { %586 = vst [vmem:[%s227_s14 + $0x28] sm:$0xff] %v568_v46  ;;  %v563_v48 = vadd.f32 %v712_v36, %v562_v47 }
 0x1c8   : > { %v822_v49 = vpop.f32.mrf.mxu1 }
 0x1c9   : > { %585 = vst [vmem:[%s227_s14 + $0x20] sm:$0xff] %v563_v48  ;;  %v578_v50 = vadd.f32 %v822_v49, %v712_v36 }
 0x1ca   : > { %v572_v51 = vpop.f32.mrf.mxu1 }
 0x1cb   : > { %588 = vst [vmem:[%s227_s14 + $0x38] sm:$0xff] %v578_v50  ;;  %v573_v52 = vadd.f32 %v712_v36, %v572_v51 }
 0x1cd   : > { %587 = vst [vmem:[%s227_s14 + $0x30] sm:$0xff] %v573_v52 }
 0x1ce   : > { %905 = shalt.err (!%p902_p5)
}
 0x1cf   : > { %s906_s8 = scalar_lea.hbm %s1145_s29, 1024  ;;  %s910_s10 = scalar_lea.hbm %s1200_s4, 2048 }
 0x1d0   : > { %p907_p6 = scmp.ne.s32.totalorder %s1145_s29, %s906_s8  ;;  %p911_p10 = scmp.lt.s32.totalorder %s1145_s29, %s1200_s4 }
 0x1d1   : > { %p912_p11 = scmp.lt.s32.totalorder %s910_s10, %s906_s8 }
 0x1d2   : > { %p908_p7 = pnand %p907_p6, %p1038_p4 }
 0x1d3   : > { %p913_p12 = por %p912_p11, %p911_p10 }
 0x1d4   : > { %p909_p9 = pneg %p908_p7 }
 0x1d6   : > { %p914_p13 = pnand %p913_p12, %p909_p9 }
 0x1d8   : > { %917 = shalt.err (!%p914_p13)
}
 0x1d9   : > { %s971_s14 = smov 128   ;;  %s972_s21 = smov 8  }
 0x1da   : > { %823 = dma.vmem_to_hbm [thread:$0]  (%p1038_p4), %s1147_s22, 1024, %s1145_s29, %s1151_s18, %s971_s14, %s971_s14, %s972_s21  }
 0x1db PF: > { %p829_p0 = scmp.ge.s32.totalorder %s968_s20, 2  ;;  %s618_s24 = sand.u32 1, %s948_s15  }
 0x1dc   : > { %s619_s26 = scalar_lea.sflag [#allocation4], %s618_s24 }
 0x1dd   : > { %p826_p1 = pnand %p829_p0, %p1045_p8 }
 0x1df   : > { %p827_p2 = pneg %p826_p1 }
 0x1e1   : > { %943 = dma.done.wait (%p827_p2), %s619_s26, 1024  }
 0x1e2   : > { %945 = vsyncadd (%p827_p2), %s619_s26, 4294966272  ;;  %s17_s20 = sadd.s32 1, %s968_s20   ;;  %s1203_s15 = smov %s952_s16 }
 0x1e3   : > { %p14_p3 = scmp.ge.s32.totalorder %s17_s20, 4   ;;  %s1204_s16 = smov %s956_s17 }
 0x1e4   : > { %s1205_s17 = smov %s1051_s28  ;;  %s1206_s18 = smov %s964_s19 }
 0x1e5   : > { %s1207_s19 = smov %s1209_s23  ;;  %16 = sbr.rel (!%p14_p3) target bundleno = 4 (0x4), region = 82 }
 0x1ea   :  { %624 = vsyncpa [#allocation4], 1 }
 0x1eb   :  { %626 = vsyncpa [#allocation4 + $0x1], 1 }

</bundles_post_ra>
